<compile_context>
chip_gen: v7x
topology: tpu7x:2x2x1
jax: 0.10.0
libtpu: 0.0.40
codegen_flags: <defaults>
</compile_context>

<pallas_src>
import jax
import jax.numpy as jnp
from jax.experimental import pallas as pl
from jax.experimental.pallas import tpu as pltpu


def linear_add_kernel(x_ref, w_ref, b_ref, y_ref, o_ref):
    # Single MXU matmul (f32 accumulate) + VPU adds on VMEM-resident tiles.
    acc = jnp.dot(x_ref[...], w_ref[...], preferred_element_type=jnp.float32)
    o_ref[...] = (acc + b_ref[...] + y_ref[...]).astype(o_ref.dtype)


def _gridless_call(x, w, b, y):
    """Tiny-B fast path: whole arrays in VMEM, no grid, no pipeline prologue."""
    B, K = x.shape
    N = w.shape[1]
    # One-time pre-broadcast of the static bias parameter (avoids in-kernel
    # sublane broadcast/retile).
    b_full = jnp.broadcast_to(b, (B, N))

    vmem_spec = pl.BlockSpec(memory_space=pltpu.MemorySpace.VMEM)
    cost = pl.CostEstimate(
        flops=2 * B * K * N,
        transcendentals=0,
        bytes_accessed=4 * (B * K + K * N + 3 * B * N),
    )
    return pl.pallas_call(
        linear_add_kernel,
        out_shape=jax.ShapeDtypeStruct((B, N), x.dtype),
        in_specs=[vmem_spec, vmem_spec, vmem_spec, vmem_spec],
        out_specs=vmem_spec,
        cost_estimate=cost,
    )(x, w, b_full, y)


def _tiled_call(x, w, b, y, bb):
    """Production-sized path: 1-D grid over batch, parallel axis (v7x 2xTC)."""
    B, K = x.shape
    N = w.shape[1]

    num_blocks = (B + bb - 1) // bb
    B_pad = num_blocks * bb
    if B_pad != B:
        pad = B_pad - B
        x = jnp.pad(x, ((0, pad), (0, 0)))
        y = jnp.pad(y, ((0, pad), (0, 0)))

    # Static-parameter bias replicated once to the tile batch size.
    b_tile = jnp.broadcast_to(b, (bb, N))

    cost = pl.CostEstimate(
        flops=2 * B_pad * K * N,
        transcendentals=0,
        bytes_accessed=4 * (B_pad * K + K * N + bb * N + 2 * B_pad * N),
    )

    out = pl.pallas_call(
        linear_add_kernel,
        out_shape=jax.ShapeDtypeStruct((B_pad, N), x.dtype),
        grid_spec=pltpu.PrefetchScalarGridSpec(
            num_scalar_prefetch=0,
            grid=(num_blocks,),
            in_specs=[
                pl.BlockSpec((bb, K), lambda i: (i, 0)),   # x batch tile
                pl.BlockSpec((K, N), lambda i: (0, 0)),    # W: whole, resident
                pl.BlockSpec((bb, N), lambda i: (0, 0)),   # bias: whole, resident
                pl.BlockSpec((bb, N), lambda i: (i, 0)),   # y batch tile
            ],
            out_specs=pl.BlockSpec((bb, N), lambda i: (i, 0)),
        ),
        compiler_params=pltpu.CompilerParams(
            dimension_semantics=("parallel",),
        ),
        cost_estimate=cost,
    )(x, w, b_tile, y)

    return out[:B] if B_pad != B else out


def linear_add(x, w, b, y, *, block_b=1024):
    """out = x @ w + b + y  (w stored as W^T, shape (20, 30); b shape (1, 30))."""
    assert block_b % 8 == 0, "batch tile must be a multiple of the sublane (8)"
    B = x.shape[0]
    if B <= block_b:
        return _gridless_call(x, w, b, y)
    return _tiled_call(x, w, b, y, block_b)


if __name__ == "__main__":
    key = jax.random.PRNGKey(0)
    k_x, k_y, k_w, k_b, k_x2, k_y2 = jax.random.split(key, 6)

    IN, OUT = 20, 30

    # Deterministic parameter init (mimics torch.nn.Linear uniform init bound).
    bound = 1.0 / (IN ** 0.5)
    w = jax.random.uniform(k_w, (IN, OUT), dtype=jnp.float32,
                           minval=-bound, maxval=bound)   # stored as W^T
    b = jax.random.uniform(k_b, (1, OUT), dtype=jnp.float32,
                           minval=-bound, maxval=bound)

    # --- spec-sized case (gridless whole-array path) ---
    B = 8
    x = jax.random.normal(k_x, (B, IN), dtype=jnp.float32)
    y = jax.random.normal(k_y, (B, OUT), dtype=jnp.float32)

    out = linear_add(x, w, b, y)
    jax.block_until_ready(out)
    ref = x @ w + b + y
    assert jnp.allclose(out, ref, atol=1e-5, rtol=1e-5), "small-B mismatch"

    # --- larger batch exercising the tiled grid path (incl. ragged last tile) ---
    B2 = 1000
    x2 = jax.random.normal(k_x2, (B2, IN), dtype=jnp.float32)
    y2 = jax.random.normal(k_y2, (B2, OUT), dtype=jnp.float32)

    out2 = linear_add(x2, w, b, y2, block_b=256)
    jax.block_until_ready(out2)
    ref2 = x2 @ w + b + y2
    assert jnp.allclose(out2, ref2, atol=1e-5, rtol=1e-5), "tiled-B mismatch"

    print("KERNEL_OK")
</pallas_src>

<mosaic_0001>
module attributes {stable_mosaic.version = 11 : i64} {
  func.func @linear_add_kernel(%arg0: memref<8x20xf32, #tpu.memory_space<vmem>>, %arg1: memref<20x30xf32, #tpu.memory_space<vmem>>, %arg2: memref<8x30xf32, #tpu.memory_space<vmem>>, %arg3: memref<8x30xf32, #tpu.memory_space<vmem>>, %arg4: memref<8x30xf32, #tpu.memory_space<vmem>>) attributes {dimension_semantics = [], scalar_prefetch = 0 : i64, scratch_operands = 0 : i64, tpu.core_type = #tpu.core_type<tc>} {
    %c0 = arith.constant 0 : index
    %c0_0 = arith.constant 0 : index
    %0 = vector.load %arg0[%c0, %c0_0] : memref<8x20xf32, #tpu.memory_space<vmem>>, vector<8x20xf32>
    %c0_1 = arith.constant 0 : index
    %c0_2 = arith.constant 0 : index
    %1 = vector.load %arg1[%c0_1, %c0_2] : memref<20x30xf32, #tpu.memory_space<vmem>>, vector<20x30xf32>
    %cst = arith.constant dense<0.000000e+00> : vector<8x30xf32>
    %2 = tpu.matmul %0, %1, %cst {dimension_numbers = #tpu.dot_dimension_numbers<[1], [0], [0], [1], [0, 0, 1, 1], [], []>} : vector<8x20xf32>, vector<20x30xf32>, vector<8x30xf32> -> vector<8x30xf32>
    %c0_3 = arith.constant 0 : index
    %c0_4 = arith.constant 0 : index
    %3 = vector.load %arg2[%c0_3, %c0_4] : memref<8x30xf32, #tpu.memory_space<vmem>>, vector<8x30xf32>
    %4 = arith.addf %2, %3 : vector<8x30xf32>
    %c0_5 = arith.constant 0 : index
    %c0_6 = arith.constant 0 : index
    %5 = vector.load %arg3[%c0_5, %c0_6] : memref<8x30xf32, #tpu.memory_space<vmem>>, vector<8x30xf32>
    %6 = arith.addf %4, %5 : vector<8x30xf32>
    %c0_7 = arith.constant 0 : index
    %c0_8 = arith.constant 0 : index
    %7 = vector.load %arg4[%c0_7, %c0_8] : memref<8x30xf32, #tpu.memory_space<vmem>>, vector<8x30xf32>
    tpu.vector_store %arg4[%c0_7, %c0_8], %6 {strides = array<i32>} : memref<8x30xf32, #tpu.memory_space<vmem>>, vector<8x30xf32>,
    return
  }
}

</mosaic_0001>

<bundles_post_ra>
// kernel: tpu_custom_call.1
= control target key start
LH: loop header
LB: loop body
LE: loop exit
PB: predicated region body
PF: predicated region fallthrough
CT: control target
= control target key end

     0   :  { %9 = vsyncpa [#allocation3], 0  ;;  %s364_s0 = inlined_call_operand.hbm [shape: f32[8,20], index: 0, kind: input, shape index: {}]   ;;  %s365_s1 = inlined_call_operand.hbm [shape: f32[20,30], index: 1, kind: input, shape index: {}]   ;;  %s366_s2 = inlined_call_operand.hbm [shape: f32[8,30], index: 2, kind: input, shape index: {}]   ;;  %s367_s3 = inlined_call_operand.vmem [shape: f32[8,30], index: 3, kind: input, shape index: {}]   ;;  %s368_s4 = inlined_call_operand.hbm [shape: f32[8,30], index: 4, kind: output, shape index: {}]  }
   0x1   :  { %10 = vsyncpa [#allocation6], 0 }
   0x2   :  { %11 = vsyncpa [#allocation4], 0  ;;  %s279_s15 = smov [#allocation5]   ;;  %s185_s19 = scalar_lea.hbm %s365_s1, 384 }
   0x3   :  { %s27_s16 = sshll.u32 %s279_s15, 4  ;;  %p186_p0 = scmp.ne.s32.totalorder %s365_s1, %s185_s19  ;;  %s28_s16 = int_to_ptr.vmem [resolvable:$true] %s27_s16 }
   0x4   :  { %p189_p1 = scmp.lt.u32.totalorder %s185_s19, %s365_s1 }
   0x6   :  { %p191_p2 = pnand %p189_p1, %p186_p0 }
   0x8   :  { %194 = shalt.err (!%p191_p2)
}
   0x9   :  { %s195_s24 = scalar_lea.vmem %s28_s16, 384  ;;  %p200_p4 = scmp.lt.s32.totalorder %s28_s16, %s28_s16 }
   0xa   :  { %p196_p3 = scmp.ne.s32.totalorder %s28_s16, %s195_s24  ;;  %p201_p5 = scmp.lt.s32.totalorder %s195_s24, %s195_s24 }
   0xc   :  { %p202_p6 = por %p201_p5, %p200_p4 }
   0xe   :  { %p203_p7 = pnand %p202_p6, %p196_p3 }
  0x10   :  { %206 = shalt.err (!%p203_p7)
}
  0x11   :  { %s280_s25 = smov 128   ;;  %s281_s26 = smov 8  }
  0x12   :  { %33 = dma.hbm_to_vmem [thread:$0]  %s365_s1, 384, %s28_s16, [#allocation6], %s280_s25, %s280_s25, %s281_s26  }
  0x13   :  { %s282_s29 = smov [#allocation2]   ;;  %s283_s5 = smov [#allocation7]  }
  0x14   :  { %s18_s30 = sshll.u32 %s282_s29, 4  ;;  %s40_s6 = sshll.u32 %s283_s5, 4  ;;  %s19_s30 = int_to_ptr.vmem [resolvable:$true] %s18_s30  ;;  %s41_s6 = int_to_ptr.vmem [resolvable:$true] %s40_s6 }
  0x15   :  { %s207_s9 = scalar_lea.hbm %s364_s0, 128 }
  0x16   :  { %p208_p8 = scmp.ne.s32.totalorder %s364_s0, %s207_s9  ;;  %p211_p9 = scmp.lt.u32.totalorder %s207_s9, %s364_s0 }
  0x18   :  { %p213_p10 = pnand %p211_p9, %p208_p8 }
  0x1a   :  { %216 = shalt.err (!%p213_p10)
}
  0x1b   :  { %s217_s1 = scalar_lea.vmem %s19_s30, 128  ;;  %p222_p12 = scmp.lt.s32.totalorder %s19_s30, %s19_s30 }
  0x1c   :  { %p218_p11 = scmp.ne.s32.totalorder %s19_s30, %s217_s1  ;;  %p223_p13 = scmp.lt.s32.totalorder %s217_s1, %s217_s1 }
  0x1e   :  { %p224_p0 = por %p223_p13, %p222_p12 }
  0x20   :  { %p225_p1 = pnand %p224_p0, %p218_p11 }
  0x22   :  { %228 = shalt.err (!%p225_p1)
}
  0x23   :  { %21 = dma.hbm_to_vmem [thread:$0]  %s364_s0, 128, %s19_s30, [#allocation3]  }
  0x24   :  { %s229_s18 = scalar_lea.hbm %s366_s2, 128 }
  0x25   :  { %p230_p2 = scmp.ne.s32.totalorder %s366_s2, %s229_s18  ;;  %p233_p3 = scmp.lt.u32.totalorder %s229_s18, %s366_s2 }
  0x27   :  { %p235_p4 = pnand %p233_p3, %p230_p2 }
  0x29   :  { %238 = shalt.err (!%p235_p4)
}
  0x2a   :  { %s239_s23 = scalar_lea.vmem %s41_s6, 128  ;;  %p244_p6 = scmp.lt.s32.totalorder %s41_s6, %s41_s6 }
  0x2b   :  { %p240_p5 = scmp.ne.s32.totalorder %s41_s6, %s239_s23  ;;  %p245_p7 = scmp.lt.s32.totalorder %s239_s23, %s239_s23 }
  0x2d   :  { %p246_p8 = por %p245_p7, %p244_p6 }
  0x2f   :  { %p247_p9 = pnand %p246_p8, %p240_p5 }
  0x31   :  { %250 = shalt.err (!%p247_p9)
}
  0x32   :  { %43 = dma.hbm_to_vmem [thread:$0]  %s366_s2, 128, %s41_s6, [#allocation6]  }
  0x33   :  { %273 = dma.done.wait [#allocation3], 128  }
  0x34   :  { %274 = vsyncadd [#allocation3], 4294967168 }
  0x35   :  { %275 = dma.done.wait [#allocation6], 512  }
  0x36   :  { %276 = vsyncadd [#allocation6], 4294966784  ;;  %v284_v0 = vmov 0.0|0.0   ;;  %vm285_vm0 = vmmov 0   ;;  %v286_v1 = vmov 0.0   ;;  %v56_v2 = vld [vmem:[#allocation5] sm:$0xff] }
  0x37   :  { %173 = vmatprep.subr.bf16.mxu0 %v284_v0  ;;  %170 = vmatprep.mubr.msk.f32.mxu0 %vm285_vm0, %v286_v1  ;;  %v57_v3 = vld [vmem:[#allocation5 + $0x8] sm:$0xff]  ;;  %v58_v5 = vld [vmem:[#allocation5 + $0x10] sm:$0xf]  ;;  %vm64_vm1 = vcmask 1043456   ;;  %v55_v6 = vld [vmem:[#allocation2] sm:$0xff]  ;;  %vm60_vm2 = vcmask 162816  }
  0x38   :  { %v174_v4 = vpack.c.bf16 %v57_v3, %v56_v2  ;;  %v59_v7 = vld [vmem:[#allocation7] sm:$0xff]  ;;  %s287_s26 = smov [#allocation8]   ;;  %vm140_vm3 = vcmask 244736  }
  0x39   :  { %v138_v9 = vld [vmem:[%s367_s3] sm:$0xff]  ;;  %s148_s27 = sshll.u32 %s287_s26, 4  ;;  %s149_s27 = int_to_ptr.vmem [resolvable:$true] %s148_s27 }
  0x3a   :  { %175 = vmatpush3.bf16.msra.mxu0 %v174_v4  ;;  %s251_s28 = scalar_lea.vmem %s149_s27, 128  ;;  %p256_p11 = scmp.lt.s32.totalorder %s149_s27, %s149_s27 }
  0x3b   :  { %168 = vmatprep.subr.mxu0 %v286_v1  ;;  %p252_p10 = scmp.ne.s32.totalorder %s149_s27, %s251_s28  ;;  %p257_p12 = scmp.lt.s32.totalorder %s251_s28, %s251_s28 }
  0x3d   :  { %p258_p13 = por %p257_p12, %p256_p11 }
  0x3e   :  { %169 = vmatpush3.msk.msra.mxu0 %vm64_vm1, %v58_v5 }
  0x3f   :  { %171 = vmatmul.mubr.msk.f32.vlgmr.msra.gmra.mrb[0].mxu0 %vm60_vm2, %v55_v6  ;;  %p259_p0 = pnand %p258_p13, %p252_p10 }
 0x112   :  { %v134_v8 = vpop.f32.mrb[0].mxu0 }
 0x113   :  { %v135_v10 = vadd.f32 %v134_v8, %v59_v7  ;;  %v172_v11 = vpop.f32.mrb[1].mxu0 }
 0x115   :  { %v139_v12 = vadd.f32 %v138_v9, %v135_v10 }
 0x117   :  { %141 = vst.msk [vmem:[#allocation8] sm:$0xff] %vm140_vm3, %v139_v12 }
 0x118   :  { %262 = shalt.err (!%p259_p0)
}
 0x119   :  { %s263_s5 = scalar_lea.hbm %s368_s4, 128 }
 0x11a   :  { %p264_p1 = scmp.ne.s32.totalorder %s368_s4, %s263_s5  ;;  %p267_p2 = scmp.lt.u32.totalorder %s263_s5, %s368_s4 }
 0x11c   :  { %p269_p3 = pnand %p267_p2, %p264_p1 }
 0x11e   :  { %272 = shalt.err (!%p269_p3)
}
 0x11f   :  { %151 = dma.vmem_to_hbm [thread:$0]  %s149_s27, 128, %s368_s4, [#allocation4]  }
 0x120   :  { %277 = dma.done.wait [#allocation4], 128  }
 0x121   :  { %278 = vsyncadd [#allocation4], 4294967168 }
 0x122   :  { %155 = vsyncpa [#allocation3], 1 }
 0x123   :  { %156 = vsyncpa [#allocation6], 1 }
 0x124   :  { %157 = vsyncpa [#allocation4], 1 }

</bundles_post_ra>
